<compile_context>
chip_gen: v7x
topology: tpu7x:2x2x1
jax: 0.10.0
libtpu: 0.0.40
codegen_flags: <defaults>
</compile_context>

<pallas_src>
import functools

import jax
import jax.numpy as jnp
from jax.experimental import pallas as pl
from jax.experimental.pallas import tpu as pltpu


def _round_up(x, m):
    return ((x + m - 1) // m) * m


def _cdiv(a, b):
    return -(-a // b)


def _tpu_defaults():
    """Returns (physical VMEM bytes, whether the VPU has native bf16 ALUs)."""
    vmem_bytes = 64 * 1024 * 1024  # conservative fallback (v7x per-TC VMEM)
    try:
        vmem_bytes = int(pltpu.get_tpu_info().vmem_capacity_bytes)
    except Exception:
        pass
    kind = ""
    try:
        kind = jax.devices()[0].device_kind.lower()
    except Exception:
        pass
    # v6e/v7x VPUs have bf16 ALUs; v5e (and older generations) do not, so the
    # epilogue stays f32 there (a bf16 epilogue would be emulated via converts).
    bf16_vpu = not any(tag in kind for tag in ("v2", "v3", "v4", "v5"))
    return vmem_bytes, bf16_vpu


def critic_kernel(x_ref, w1_ref, b1_ref, w2_ref, b2_ref, w3r_ref, b3_ref, o_ref,
                  *, mxu_dtype, epilogue_dtype):
    # fc1: cast the f32 tile to bf16 on the VPU (hidden under the MXU), MXU
    # matmul with f32 accumulation.
    x = x_ref[...].astype(mxu_dtype)
    h1 = jnp.dot(x, w1_ref[...], preferred_element_type=jnp.float32)
    # Epilogue (bias + ReLU) in bf16 on v6e/v7x, f32 on v5e.
    h1 = jnp.maximum(h1.astype(epilogue_dtype) + b1_ref[...], 0).astype(mxu_dtype)
    # fc2 + ReLU.
    h2 = jnp.dot(h1, w2_ref[...], preferred_element_type=jnp.float32)
    h2 = jnp.maximum(h2.astype(epilogue_dtype) + b2_ref[...], 0)
    # fc3 (H -> 1): f32 VPU multiply + XLU lane reduction instead of a 256x1
    # MXU matmul.
    q = jnp.sum(h2.astype(jnp.float32) * w3r_ref[...], axis=-1, keepdims=True)
    o_ref[...] = (q + b3_ref[...]).astype(o_ref.dtype)


def critic_forward(x, params, *, tile_b=None):
    """x: [B, state_dim] float32; params: dict of weights/biases."""
    B, S = x.shape
    H = params["w1"].shape[1]  # 256

    vmem_bytes, bf16_vpu = _tpu_defaults()
    mxu_dtype = jnp.bfloat16
    epilogue_dtype = jnp.bfloat16 if bf16_vpu else jnp.float32

    # MXU operands in bf16 (f32 accumulate); fc3 row / bias stay f32.
    w1 = params["w1"].astype(mxu_dtype)
    w2 = params["w2"].astype(mxu_dtype)
    b1 = params["b1"].astype(epilogue_dtype).reshape(1, H)
    b2 = params["b2"].astype(epilogue_dtype).reshape(1, H)
    w3_row = params["w3"].astype(jnp.float32).reshape(1, H)   # (H,1) -> (1,H)
    b3 = params["b3"].astype(jnp.float32).reshape(1, 1)

    # Generation-aware VMEM budget (explicit; default scoped limit is 32 MiB).
    vmem_limit = int(min((vmem_bytes * 3) // 4, 100 * 2**20))

    if tile_b is None:
        # Per-row VMEM estimate: f32 x tile (double-buffered) + f32 h1/h2/temp
        # + f32 output (double-buffered).  Weights are a fixed ~300 KB extra.
        per_row = 2 * S * 4 + 3 * H * 4 + 2 * 4
        cap = (min(4096, max(256, (vmem_limit // 3) // per_row)) // 8) * 8
        steps = _cdiv(_round_up(B, 8), cap)
        if B > 8:
            # >=2 (even) grid steps so v7x's two TensorCores can split the
            # "parallel" batch axis; a no-op cost on 1-TC v5e/v6e.
            steps = max(2, steps)
            steps += steps % 2
        tile_b = _round_up(_cdiv(B, steps), 8)
    tile_b = max(8, _round_up(tile_b, 8))

    num_steps = _cdiv(B, tile_b)
    padded_b = num_steps * tile_b

    x_p = x if x.dtype == jnp.float32 else x.astype(jnp.float32)
    if padded_b != B:
        x_p = jnp.pad(x_p, ((0, padded_b - B), (0, 0)))

    kernel = functools.partial(critic_kernel,
                               mxu_dtype=mxu_dtype,
                               epilogue_dtype=epilogue_dtype)

    out = pl.pallas_call(
        kernel,
        out_shape=jax.ShapeDtypeStruct((padded_b, 1), jnp.float32),
        grid=(num_steps,),
        in_specs=[
            pl.BlockSpec((tile_b, S), lambda i: (i, 0)),  # streamed x tile (f32)
            pl.BlockSpec((S, H), lambda i: (0, 0)),       # w1 (resident)
            pl.BlockSpec((1, H), lambda i: (0, 0)),       # b1
            pl.BlockSpec((H, H), lambda i: (0, 0)),       # w2 (resident)
            pl.BlockSpec((1, H), lambda i: (0, 0)),       # b2
            pl.BlockSpec((1, H), lambda i: (0, 0)),       # w3 as a row (f32)
            pl.BlockSpec((1, 1), lambda i: (0, 0)),       # b3
        ],
        out_specs=pl.BlockSpec((tile_b, 1), lambda i: (i, 0)),
        compiler_params=pltpu.CompilerParams(
            dimension_semantics=("parallel",),
            vmem_limit_bytes=vmem_limit),
    )(x_p, w1, b1, w2, b2, w3_row, b3)

    return out[:B]


def init_params(key, state_dim, hidden=256):
    # Deterministic init mimicking nn.Linear default (uniform +/- 1/sqrt(fan_in)).
    def linear(k, fan_in, fan_out):
        kw, kb = jax.random.split(k)
        bound = 1.0 / jnp.sqrt(fan_in)
        w = jax.random.uniform(kw, (fan_in, fan_out), jnp.float32, -bound, bound)
        b = jax.random.uniform(kb, (1, fan_out), jnp.float32, -bound, bound)
        return w, b

    k1, k2, k3 = jax.random.split(key, 3)
    w1, b1 = linear(k1, state_dim, hidden)
    w2, b2 = linear(k2, hidden, hidden)
    w3, b3 = linear(k3, hidden, 1)
    return {"w1": w1, "b1": b1, "w2": w2, "b2": b2, "w3": w3, "b3": b3}


def critic_ref_mirrored(x, p, *, mxu_dtype=jnp.bfloat16, epilogue_dtype=jnp.float32):
    # Mirrors the kernel's exact dtype handling (bf16 MXU operands, f32 accum,
    # chip-dependent epilogue dtype, f32 fc3 head).
    h1 = jnp.dot(x.astype(mxu_dtype), p["w1"].astype(mxu_dtype),
                 preferred_element_type=jnp.float32)
    h1 = jnp.maximum(h1.astype(epilogue_dtype) + p["b1"].astype(epilogue_dtype),
                     0).astype(mxu_dtype)
    h2 = jnp.dot(h1, p["w2"].astype(mxu_dtype), preferred_element_type=jnp.float32)
    h2 = jnp.maximum(h2.astype(epilogue_dtype) + p["b2"].astype(epilogue_dtype), 0)
    q = jnp.sum(h2.astype(jnp.float32) * p["w3"].reshape(1, -1).astype(jnp.float32),
                axis=-1, keepdims=True)
    return q + p["b3"].astype(jnp.float32)


def critic_ref_f32(x, p):
    # Full-precision reference of the PyTorch module (looser tolerance: the
    # kernel is bf16-bounded by its MXU operands).
    h1 = jnp.maximum(x @ p["w1"] + p["b1"], 0.0)
    h2 = jnp.maximum(h1 @ p["w2"] + p["b2"], 0.0)
    return h2 @ p["w3"] + p["b3"]


if __name__ == "__main__":
    key = jax.random.PRNGKey(0)
    kp, kx1, kx2 = jax.random.split(key, 3)

    state_dim = 32
    params = init_params(kp, state_dim)

    _, _bf16_vpu = _tpu_defaults()
    _epi = jnp.bfloat16 if _bf16_vpu else jnp.float32

    # Small case (single grid step).
    batch = 8
    x = jax.random.normal(kx1, (batch, state_dim), jnp.float32)
    out = jax.block_until_ready(critic_forward(x, params))
    assert out.shape == (batch, 1), out.shape
    ref_m = critic_ref_mirrored(x, params, epilogue_dtype=_epi)
    ref_f = critic_ref_f32(x, params)
    assert jnp.allclose(out, ref_m, atol=2e-3, rtol=2e-3), "mismatch vs mirrored ref (B=8)"
    assert jnp.allclose(out, ref_f, atol=5e-2, rtol=5e-2), "mismatch vs f32 ref (B=8)"

    # Larger non-multiple batch: default heuristic (>=2 grid steps + padding)
    # and an explicit tile_b (3-step grid).
    batch2 = 300
    x2 = jax.random.normal(kx2, (batch2, state_dim), jnp.float32)
    out2a = jax.block_until_ready(critic_forward(x2, params))
    out2b = jax.block_until_ready(critic_forward(x2, params, tile_b=128))
    ref2_m = critic_ref_mirrored(x2, params, epilogue_dtype=_epi)
    ref2_f = critic_ref_f32(x2, params)
    for o in (out2a, out2b):
        assert o.shape == (batch2, 1), o.shape
        assert jnp.allclose(o, ref2_m, atol=2e-3, rtol=2e-3), "mismatch vs mirrored ref (B=300)"
        assert jnp.allclose(o, ref2_f, atol=5e-2, rtol=5e-2), "mismatch vs f32 ref (B=300)"

    print("KERNEL_OK")
</pallas_src>

<mosaic_0001>
module attributes {stable_mosaic.version = 11 : i64} {
  func.func @critic_kernel(%arg0: i32, %arg1: memref<8x32xf32, #tpu.memory_space<vmem>>, %arg2: memref<32x256xbf16, #tpu.memory_space<vmem>>, %arg3: memref<1x256xbf16, #tpu.memory_space<vmem>>, %arg4: memref<256x256xbf16, #tpu.memory_space<vmem>>, %arg5: memref<1x256xbf16, #tpu.memory_space<vmem>>, %arg6: memref<1x256xf32, #tpu.memory_space<vmem>>, %arg7: memref<1x1xf32, #tpu.memory_space<vmem>>, %arg8: memref<8x1xf32, #tpu.memory_space<vmem>>) attributes {dimension_semantics = [#tpu.dimension_semantics<parallel>], iteration_bounds = array<i64: 1>, scalar_prefetch = 0 : i64, scratch_operands = 0 : i64, tpu.core_type = #tpu.core_type<tc>, window_params = [{transform_indices = @transform_0, window_bounds = array<i64: 8, 32>}, {pipeline_mode = #tpu.pipeline_mode<synchronous>, transform_indices = @transform_1, window_bounds = array<i64: 32, 256>}, {pipeline_mode = #tpu.pipeline_mode<synchronous>, transform_indices = @transform_2, window_bounds = array<i64: 1, 256>}, {pipeline_mode = #tpu.pipeline_mode<synchronous>, transform_indices = @transform_3, window_bounds = array<i64: 256, 256>}, {pipeline_mode = #tpu.pipeline_mode<synchronous>, transform_indices = @transform_4, window_bounds = array<i64: 1, 256>}, {pipeline_mode = #tpu.pipeline_mode<synchronous>, transform_indices = @transform_5, window_bounds = array<i64: 1, 256>}, {pipeline_mode = #tpu.pipeline_mode<synchronous>, transform_indices = @transform_6, window_bounds = array<i64: 1, 1>}, {transform_indices = @transform_7, window_bounds = array<i64: 8, 1>}]} {
    %c0 = arith.constant 0 : index
    %c0_0 = arith.constant 0 : index
    %0 = vector.load %arg1[%c0, %c0_0] : memref<8x32xf32, #tpu.memory_space<vmem>>, vector<8x32xf32>
    %1 = arith.truncf %0 : vector<8x32xf32> to vector<8x32xbf16>
    %c0_1 = arith.constant 0 : index
    %c0_2 = arith.constant 0 : index
    %2 = vector.load %arg2[%c0_1, %c0_2] : memref<32x256xbf16, #tpu.memory_space<vmem>>, vector<32x256xbf16>
    %cst = arith.constant dense<0.000000e+00> : vector<8x256xf32>
    %3 = tpu.matmul %1, %2, %cst {dimension_numbers = #tpu.dot_dimension_numbers<[1], [0], [0], [1], [0, 0, 1, 1], [], []>} : vector<8x32xbf16>, vector<32x256xbf16>, vector<8x256xf32> -> vector<8x256xf32>
    %4 = arith.truncf %3 : vector<8x256xf32> to vector<8x256xbf16>
    %c0_3 = arith.constant 0 : index
    %c0_4 = arith.constant 0 : index
    %5 = vector.load %arg3[%c0_3, %c0_4] : memref<1x256xbf16, #tpu.memory_space<vmem>>, vector<1x256xbf16>
    %6 = vector.broadcast %5 : vector<1x256xbf16> to vector<8x256xbf16>
    %7 = arith.addf %4, %6 : vector<8x256xbf16>
    %cst_5 = arith.constant 0.000000e+00 : bf16
    %8 = vector.broadcast %cst_5 : bf16 to vector<8x256xbf16>
    %9 = arith.maximumf %7, %8 : vector<8x256xbf16>
    %c0_6 = arith.constant 0 : index
    %c0_7 = arith.constant 0 : index
    %10 = vector.load %arg4[%c0_6, %c0_7] : memref<256x256xbf16, #tpu.memory_space<vmem>>, vector<256x256xbf16>
    %cst_8 = arith.constant dense<0.000000e+00> : vector<8x256xf32>
    %11 = tpu.matmul %9, %10, %cst_8 {dimension_numbers = #tpu.dot_dimension_numbers<[1], [0], [0], [1], [0, 0, 1, 1], [], []>} : vector<8x256xbf16>, vector<256x256xbf16>, vector<8x256xf32> -> vector<8x256xf32>
    %12 = arith.truncf %11 : vector<8x256xf32> to vector<8x256xbf16>
    %c0_9 = arith.constant 0 : index
    %c0_10 = arith.constant 0 : index
    %13 = vector.load %arg5[%c0_9, %c0_10] : memref<1x256xbf16, #tpu.memory_space<vmem>>, vector<1x256xbf16>
    %14 = vector.broadcast %13 : vector<1x256xbf16> to vector<8x256xbf16>
    %15 = arith.addf %12, %14 : vector<8x256xbf16>
    %cst_11 = arith.constant 0.000000e+00 : bf16
    %16 = vector.broadcast %cst_11 : bf16 to vector<8x256xbf16>
    %17 = arith.maximumf %15, %16 : vector<8x256xbf16>
    %18 = arith.extf %17 : vector<8x256xbf16> to vector<8x256xf32>
    %c0_12 = arith.constant 0 : index
    %c0_13 = arith.constant 0 : index
    %19 = vector.load %arg6[%c0_12, %c0_13] : memref<1x256xf32, #tpu.memory_space<vmem>>, vector<1x256xf32>
    %20 = vector.broadcast %19 : vector<1x256xf32> to vector<8x256xf32>
    %21 = arith.mulf %18, %20 : vector<8x256xf32>
    %cst_14 = arith.constant dense<0.000000e+00> : vector<8xf32>
    %22 = vector.multi_reduction <add>, %21, %cst_14 [1] : vector<8x256xf32> to vector<8xf32>
    %23 = vector.shape_cast %22 : vector<8xf32> to vector<8x1xf32>
    %c0_15 = arith.constant 0 : index
    %c0_16 = arith.constant 0 : index
    %24 = vector.load %arg7[%c0_15, %c0_16] : memref<1x1xf32, #tpu.memory_space<vmem>>, vector<1x1xf32>
    %25 = vector.broadcast %24 : vector<1x1xf32> to vector<8x1xf32>
    %26 = arith.addf %23, %25 : vector<8x1xf32>
    %c0_17 = arith.constant 0 : index
    %c0_18 = arith.constant 0 : index
    %27 = vector.load %arg8[%c0_17, %c0_18] : memref<8x1xf32, #tpu.memory_space<vmem>>, vector<8x1xf32>
    tpu.vector_store %arg8[%c0_17, %c0_18], %26 {strides = array<i32>} : memref<8x1xf32, #tpu.memory_space<vmem>>, vector<8x1xf32>,
    return
  }
  func.func @transform_0(%arg0: i32) -> (i32, i32) {
    %c0_i32 = arith.constant 0 : i32
    %c0_i32_0 = arith.constant 0 : i32
    return %arg0, %c0_i32 : i32, i32
  }
  func.func @transform_1(%arg0: i32) -> (i32, i32) {
    %c0_i32 = arith.constant 0 : i32
    %c0_i32_0 = arith.constant 0 : i32
    %c0_i32_1 = arith.constant 0 : i32
    return %c0_i32, %c0_i32_0 : i32, i32
  }
  func.func @transform_2(%arg0: i32) -> (i32, i32) {
    %c0_i32 = arith.constant 0 : i32
    %c0_i32_0 = arith.constant 0 : i32
    %c0_i32_1 = arith.constant 0 : i32
    return %c0_i32, %c0_i32_0 : i32, i32
  }
  func.func @transform_3(%arg0: i32) -> (i32, i32) {
    %c0_i32 = arith.constant 0 : i32
    %c0_i32_0 = arith.constant 0 : i32
    %c0_i32_1 = arith.constant 0 : i32
    return %c0_i32, %c0_i32_0 : i32, i32
  }
  func.func @transform_4(%arg0: i32) -> (i32, i32) {
    %c0_i32 = arith.constant 0 : i32
    %c0_i32_0 = arith.constant 0 : i32
    %c0_i32_1 = arith.constant 0 : i32
    return %c0_i32, %c0_i32_0 : i32, i32
  }
  func.func @transform_5(%arg0: i32) -> (i32, i32) {
    %c0_i32 = arith.constant 0 : i32
    %c0_i32_0 = arith.constant 0 : i32
    %c0_i32_1 = arith.constant 0 : i32
    return %c0_i32, %c0_i32_0 : i32, i32
  }
  func.func @transform_6(%arg0: i32) -> (i32, i32) {
    %c0_i32 = arith.constant 0 : i32
    %c0_i32_0 = arith.constant 0 : i32
    %c0_i32_1 = arith.constant 0 : i32
    return %c0_i32, %c0_i32_0 : i32, i32
  }
  func.func @transform_7(%arg0: i32) -> (i32, i32) {
    %c0_i32 = arith.constant 0 : i32
    %c0_i32_0 = arith.constant 0 : i32
    return %arg0, %c0_i32 : i32, i32
  }
}

</mosaic_0001>

<bundles_post_ra>
// kernel: tpu_custom_call.1
= control target key start
LH: loop header
LB: loop body
LE: loop exit
PB: predicated region body
PF: predicated region fallthrough
CT: control target
= control target key end

     0   :  { %s775_s0 = inlined_call_operand.hbm [shape: f32[8,32], index: 0, kind: input, shape index: {}]   ;;  %s776_s1 = inlined_call_operand.hbm [shape: bf16[32,256], index: 1, kind: input, shape index: {}]   ;;  %s777_s2 = inlined_call_operand.vmem [shape: bf16[1,256], index: 2, kind: input, shape index: {}]   ;;  %s778_s3 = inlined_call_operand.hbm [shape: bf16[256,256], index: 3, kind: input, shape index: {}]   ;;  %s779_s4 = inlined_call_operand.vmem [shape: bf16[1,256], index: 4, kind: input, shape index: {}]   ;;  %s780_s5 = inlined_call_operand.vmem [shape: f32[1,256], index: 5, kind: input, shape index: {}]   ;;  %s781_s6 = inlined_call_operand.<no memory space> [shape: f32[1,1], index: 6, kind: input, shape index: {}]   ;;  %s782_s7 = inlined_call_operand.vmem [shape: f32[8,1], index: 7, kind: output, shape index: {}]  }
   0x1   :  { %v12_v0 = vstv %s781_s6 }
   0x2   :  { %13 = vst [vmem:[#allocation2] sm:$0x1] %v12_v0 }
   0x3   :  { %14 = vsyncpa [#allocation4], 0 }
   0x4   :  { %15 = vsyncpa [#allocation6], 0  ;;  %s666_s26 = smov [#allocation5]   ;;  %s596_s30 = scalar_lea.hbm %s776_s1, 512 }
   0x5   :  { %s31_s27 = sshll.u32 %s666_s26, 4  ;;  %p597_p0 = scmp.ne.s32.totalorder %s776_s1, %s596_s30  ;;  %s32_s27 = int_to_ptr.vmem [resolvable:$true] %s31_s27 }
   0x6   :  { %p600_p1 = scmp.lt.u32.totalorder %s596_s30, %s776_s1 }
   0x8   :  { %p602_p2 = pnand %p600_p1, %p597_p0 }
   0xa   :  { %605 = shalt.err (!%p602_p2)
}
   0xb   :  { %s606_s6 = scalar_lea.vmem %s32_s27, 512  ;;  %p611_p4 = scmp.lt.s32.totalorder %s32_s27, %s32_s27 }
   0xc   :  { %p607_p3 = scmp.ne.s32.totalorder %s32_s27, %s606_s6  ;;  %p612_p5 = scmp.lt.s32.totalorder %s606_s6, %s606_s6 }
   0xe   :  { %p613_p6 = por %p612_p5, %p611_p4 }
  0x10   :  { %p614_p7 = pnand %p613_p6, %p607_p3 }
  0x12   :  { %617 = shalt.err (!%p614_p7)
}
  0x13   :  { %s667_s12 = smov 128   ;;  %s668_s13 = smov 8  }
  0x14   :  { %37 = dma.hbm_to_vmem [thread:$0]  %s776_s1, 512, %s32_s27, [#allocation6], %s667_s12, %s667_s12, %s668_s13  }
  0x15   :  { %s669_s16 = smov [#allocation3]   ;;  %s670_s18 = smov [#allocation7]  }
  0x16   :  { %s22_s17 = sshll.u32 %s669_s16, 4  ;;  %s45_s19 = sshll.u32 %s670_s18, 4  ;;  %s23_s17 = int_to_ptr.vmem [resolvable:$true] %s22_s17  ;;  %s46_s19 = int_to_ptr.vmem [resolvable:$true] %s45_s19 }
  0x17   :  { %s618_s22 = scalar_lea.hbm %s775_s0, 128 }
  0x18   :  { %p619_p8 = scmp.ne.s32.totalorder %s775_s0, %s618_s22  ;;  %p622_p9 = scmp.lt.u32.totalorder %s618_s22, %s775_s0 }
  0x1a   :  { %p624_p10 = pnand %p622_p9, %p619_p8 }
  0x1c   :  { %627 = shalt.err (!%p624_p10)
}
  0x1d   :  { %s628_s1 = scalar_lea.vmem %s23_s17, 128  ;;  %p633_p12 = scmp.lt.s32.totalorder %s23_s17, %s23_s17 }
  0x1e   :  { %p629_p11 = scmp.ne.s32.totalorder %s23_s17, %s628_s1  ;;  %p634_p13 = scmp.lt.s32.totalorder %s628_s1, %s628_s1 }
  0x20   :  { %p635_p0 = por %p634_p13, %p633_p12 }
  0x22   :  { %p636_p1 = pnand %p635_p0, %p629_p11 }
  0x24   :  { %639 = shalt.err (!%p636_p1)
}
  0x25   :  { %25 = dma.hbm_to_vmem [thread:$0]  %s775_s0, 128, %s23_s17, [#allocation4]  }
  0x26   :  { %s640_s8 = scalar_lea.hbm %s778_s3, 4096 }
  0x27   :  { %p641_p2 = scmp.ne.s32.totalorder %s778_s3, %s640_s8  ;;  %p644_p3 = scmp.lt.u32.totalorder %s640_s8, %s778_s3 }
  0x29   :  { %p646_p4 = pnand %p644_p3, %p641_p2 }
  0x2b   :  { %649 = shalt.err (!%p646_p4)
}
  0x2c   :  { %s650_s14 = scalar_lea.vmem %s46_s19, 4096  ;;  %p655_p6 = scmp.lt.s32.totalorder %s46_s19, %s46_s19 }
  0x2d   :  { %p651_p5 = scmp.ne.s32.totalorder %s46_s19, %s650_s14  ;;  %p656_p7 = scmp.lt.s32.totalorder %s650_s14, %s650_s14 }
  0x2f   :  { %p657_p8 = por %p656_p7, %p655_p6 }
  0x31   :  { %p658_p9 = pnand %p657_p8, %p651_p5 }
  0x33   :  { %661 = shalt.err (!%p658_p9)
}
  0x34   :  { %51 = dma.hbm_to_vmem [thread:$0]  %s778_s3, 4096, %s46_s19, [#allocation6], %s667_s12, %s667_s12, %s668_s13  }
  0x35   :  { %662 = dma.done.wait [#allocation4], 128  }
  0x36   :  { %663 = vsyncadd [#allocation4], 4294967168 }
  0x37   :  { %664 = dma.done.wait [#allocation6], 4608  }
  0x38   :  { %665 = vsyncadd [#allocation6], 4294962688  ;;  %v671_v1 = vmov 0   ;;  %v542_v2 = vld [vmem:[#allocation5 + $0x4] ss:$8 sps:$4 sm:$0xff]   ;;  %v68_v6 = vld [vmem:[#allocation3] sm:$0xff]  ;;  %v154_v42 = vlaneseq }
  0x39   :  { %130 = vmatprep.mubr.bf16.mxu0 %v671_v1  ;;  %v544_v3 = vld [vmem:[#allocation5] ss:$8 sps:$4 sm:$0xff]   ;;  %98 = vmatprep.subr.bf16.mxu0 %v542_v2  ;;  %v545_v4 = vld [vmem:[#allocation5 + $0x14] ss:$8 sps:$4 sm:$0xff]   ;;  %v547_v5 = vld [vmem:[#allocation5 + $0x10] ss:$8 sps:$4 sm:$0xff]   ;;  %v69_v10 = vpack.c.bf16 %v68_v6, %v68_v6 }
  0x3a   :  { %99 = vmatpush1.bf16.msra.mxu0 %v544_v3  ;;  %v548_v7 = vld [vmem:[#allocation7 + $0x4] ss:$8 sps:$4 sm:$0xff]   ;;  %v550_v8 = vld [vmem:[#allocation7] ss:$8 sps:$4 sm:$0xff]   ;;  %v551_v9 = vld [vmem:[#allocation7 + $0x14] ss:$8 sps:$4 sm:$0xff]  }
  0x3b   :  { %100 = vmatprep.subr.bf16.mxu0 %v545_v4  ;;  %375 = vmatprep.subr.bf16.mxu1 %v548_v7  ;;  %v553_v11 = vld [vmem:[#allocation7 + $0x10] ss:$8 sps:$4 sm:$0xff]   ;;  %vm94_vm0 = vcmask 261120   ;;  %v554_v12 = vld [vmem:[#allocation7 + $0x24] ss:$8 sps:$4 sm:$0xff]   ;;  %v155_v44 = vshrl.u32 %v154_v42, 7 }
  0x3c   :  { %376 = vmatpush1.bf16.msra.mxu1 %v550_v8  ;;  %v556_v13 = vld [vmem:[#allocation7 + $0x20] ss:$8 sps:$4 sm:$0xff]   ;;  %v557_v14 = vld [vmem:[#allocation7 + $0x34] ss:$8 sps:$4 sm:$0xff]   ;;  %v559_v15 = vld [vmem:[#allocation7 + $0x30] ss:$8 sps:$4 sm:$0xff]  }
  0x3d   :  { %377 = vmatprep.subr.bf16.mxu1 %v551_v9  ;;  %v560_v16 = vld [vmem:[#allocation7 + $0x44] ss:$8 sps:$4 sm:$0xff]   ;;  %v562_v17 = vld [vmem:[#allocation7 + $0x40] ss:$8 sps:$4 sm:$0xff]   ;;  %v563_v18 = vld [vmem:[#allocation7 + $0x54] ss:$8 sps:$4 sm:$0xff]  }
  0x3e   :  { %101 = vmatpush1.bf16.msra.mxu0 %v547_v5  ;;  %v565_v19 = vld [vmem:[#allocation7 + $0x50] ss:$8 sps:$4 sm:$0xff]   ;;  %v566_v20 = vld [vmem:[#allocation7 + $0x64] ss:$8 sps:$4 sm:$0xff]   ;;  %v568_v21 = vld [vmem:[#allocation7 + $0x60] ss:$8 sps:$4 sm:$0xff]  }
  0x3f   :  { %v569_v22 = vld [vmem:[#allocation7 + $0x74] ss:$8 sps:$4 sm:$0xff]   ;;  %v571_v23 = vld [vmem:[#allocation7 + $0x70] ss:$8 sps:$4 sm:$0xff]   ;;  %v572_v24 = vld [vmem:[#allocation7 + $0x84] ss:$8 sps:$4 sm:$0xff]  }
  0x40   :  { %378 = vmatpush1.bf16.msra.mxu1 %v553_v11  ;;  %v574_v25 = vld [vmem:[#allocation7 + $0x80] ss:$8 sps:$4 sm:$0xff]   ;;  %v575_v26 = vld [vmem:[#allocation7 + $0x94] ss:$8 sps:$4 sm:$0xff]   ;;  %v577_v27 = vld [vmem:[#allocation7 + $0x90] ss:$8 sps:$4 sm:$0xff]  }
  0x41   :  { %499 = vmatmul.mubr.msk.bf16.vlgmr.msra.gmra.mrb[0].mxu0 %vm94_vm0, %v69_v10  ;;  %379 = vmatprep.subr.bf16.mxu1 %v554_v12  ;;  %v578_v28 = vld [vmem:[#allocation7 + $0xa4] ss:$8 sps:$4 sm:$0xff]   ;;  %v580_v29 = vld [vmem:[#allocation7 + $0xa0] ss:$8 sps:$4 sm:$0xff]   ;;  %v581_v30 = vld [vmem:[#allocation7 + $0xb4] ss:$8 sps:$4 sm:$0xff]  }
  0x42   :  { %v583_v31 = vld [vmem:[#allocation7 + $0xb0] ss:$8 sps:$4 sm:$0xff]   ;;  %v584_v32 = vld [vmem:[#allocation7 + $0xc4] ss:$8 sps:$4 sm:$0xff]   ;;  %v586_v33 = vld [vmem:[#allocation7 + $0xc0] ss:$8 sps:$4 sm:$0xff]  }
  0x43   :  { %v587_v34 = vld [vmem:[#allocation7 + $0xd4] ss:$8 sps:$4 sm:$0xff]   ;;  %v589_v35 = vld [vmem:[#allocation7 + $0xd0] ss:$8 sps:$4 sm:$0xff]   ;;  %v590_v36 = vld [vmem:[#allocation7 + $0xe4] ss:$8 sps:$4 sm:$0xff]  }
  0x44   :  { %380 = vmatpush1.bf16.msra.mxu1 %v556_v13  ;;  %v592_v37 = vld [vmem:[#allocation7 + $0xe0] ss:$8 sps:$4 sm:$0xff]   ;;  %v593_v38 = vld [vmem:[#allocation7 + $0xf4] ss:$8 sps:$4 sm:$0xff]   ;;  %v595_v39 = vld [vmem:[#allocation7 + $0xf0] ss:$8 sps:$4 sm:$0xff]  }
  0x45   :  { %381 = vmatprep.subr.bf16.mxu1 %v557_v14  ;;  %v672_v40 = vmov 1966171168   ;;  %v500_v45 = vld.sshfl [vmem:[%s777_s2] sm:$0x11 pattern:$0x75316420] }
  0x46   :  { %v152_v41 = vunpack.c.l.s4 %v672_v40  ;;  %v150_v47 = vcombine.high %v500_v45, %v500_v45  ;;  %v170_v51 = vsub.s32 0, %v155_v44  ;;  %v533_v2 = vld.sshfl [vmem:[%s779_s4] sm:$0x11 pattern:$0x75316420]  ;;  %vm487_vm1 = vcmask 7168  }
  0x47   :  { %v427_v3 = vcombine.high %v533_v2, %v533_v2 }
  0x48   :  { %382 = vmatpush1.bf16.msra.mxu1 %v559_v15  ;;  %v153_v43 = vunpack.c.0.s8 %v152_v41  ;;  %v462_v15 = vld [vmem:[%s780_s5] sm:$0x3] }
  0x49   :  { %383 = vmatprep.subr.bf16.mxu1 %v560_v16  ;;  %v470_v16 = vsub.s32 1, %v155_v44 }
  0x4a   :  { %v156_v46 = vsub.s32 %v153_v43, %v155_v44 }
  0x4c   :  { %384 = vmatpush1.bf16.msra.mxu1 %v562_v17  ;;  %v157_v48 = vrot.slane %v500_v45, %v156_v46  ;;  %v164_v49 = vrot.slane %v150_v47, %v156_v46  ;;  %v434_v4 = vrot.slane %v533_v2, %v156_v46  ;;  %v441_v5 = vrot.slane %v427_v3, %v156_v46 }
  0x4d   :  { %385 = vmatprep.subr.bf16.mxu1 %v563_v18 }
  0x4e   :  { %v166_v50 = vpack.i.b16 %v157_v48, %v157_v48  ;;  %v173_v52 = vpack.i.b16 %v164_v49, %v164_v49  ;;  %v443_v6 = vpack.i.b16 %v434_v4, %v434_v4  ;;  %v450_v7 = vpack.i.b16 %v441_v5, %v441_v5 }
  0x50   :  { %386 = vmatpush1.bf16.msra.mxu1 %v565_v19  ;;  %v171_v53 = vrot.slane %v166_v50, %v170_v51  ;;  %v178_v55 = vrot.slane %v173_v52, %v170_v51  ;;  %v448_v8 = vrot.slane %v443_v6, %v170_v51  ;;  %v455_v10 = vrot.slane %v450_v7, %v170_v51 }
  0x51   :  { %387 = vmatprep.subr.bf16.mxu1 %v566_v20 }
  0x54   :  { %388 = vmatpush1.bf16.msra.mxu1 %v568_v21  ;;  %v467_v21 = vrot.slane %v462_v15, %v170_v51 }
  0x55   :  { %389 = vmatprep.subr.bf16.mxu1 %v569_v22 }
  0x58   :  { %390 = vmatpush1.bf16.msra.mxu1 %v571_v23  ;;  %v471_v23 = vrot.slane %v462_v15, %v470_v16 }
  0x59   :  { %391 = vmatprep.subr.bf16.mxu1 %v572_v24 }
  0x5c   :  { %392 = vmatpush1.bf16.msra.mxu1 %v574_v25 }
  0x5d   :  { %393 = vmatprep.subr.bf16.mxu1 %v575_v26 }
  0x60   :  { %394 = vmatpush1.bf16.msra.mxu1 %v577_v27 }
  0x61   :  { %395 = vmatprep.subr.bf16.mxu1 %v578_v28 }
  0x64   :  { %396 = vmatpush1.bf16.msra.mxu1 %v580_v29  ;;  %v534_v29 = vld [vmem:[#allocation2] ss:$0 sm:$0xff] }
  0x65   :  { %397 = vmatprep.subr.bf16.mxu1 %v581_v30 }
  0x68   :  { %398 = vmatpush1.bf16.msra.mxu1 %v583_v31 }
  0x69   :  { %399 = vmatprep.subr.bf16.mxu1 %v584_v32 }
  0x6c   :  { %400 = vmatpush1.bf16.msra.mxu1 %v586_v33 }
  0x6d   :  { %401 = vmatprep.subr.bf16.mxu1 %v587_v34 }
  0x70   :  { %402 = vmatpush1.bf16.msra.mxu1 %v589_v35 }
  0x71   :  { %403 = vmatprep.subr.bf16.mxu1 %v590_v36 }
  0x74   :  { %404 = vmatpush1.bf16.msra.mxu1 %v592_v37 }
  0x75   :  { %405 = vmatprep.subr.bf16.mxu1 %v593_v38 }
  0x78   :  { %406 = vmatpush1.bf16.msra.mxu1 %v595_v39 }
 0x114   :  { %v132_v54 = vpop.f32.mrb[0].mxu0 }
 0x115   :  { %v139_v56 = vpack.c.bf16 %v132_v54, %v132_v54  ;;  %v134_v57 = vpop.f32.mrb[1].mxu0 }
 0x116   :  { %v140_v58 = vpack.c.bf16 %v134_v57, %v134_v57  ;;  %v136_v59 = vpop.f32.mrb[2].mxu0 }
 0x117   :  { %v179_v60 = vadd.bf16 %v171_v53, %v139_v56  ;;  %v137_v61 = vpop.f32.mrb[3].mxu0 }
 0x118   :  { %v180_v62 = vadd.bf16 %v178_v55, %v140_v58 }
 0x119   :  { %v181_v0 = vmax.bf16 %v671_v1, %v179_v60 }
 0x11a   :  { %v182_v63 = vmax.bf16 %v671_v1, %v180_v62 }
 0x11c   :  { %407 = vmatprep.mubr.bf16.mxu1 %v182_v63 }
 0x11d   :  { %408 = vmatmul.mubr.bf16.vlgmr.msra.gmra.mrb[0].mxu1 %v181_v0 }
 0x1f0   :  { %v409_v9 = vpop.f32.mrb[0].mxu1 }
 0x1f1   :  { %v416_v11 = vpack.c.bf16 %v409_v9, %v409_v9  ;;  %v411_v12 = vpop.f32.mrb[1].mxu1 }
 0x1f2   :  { %v417_v13 = vpack.c.bf16 %v411_v12, %v411_v12  ;;  %v413_v14 = vpop.f32.mrb[2].mxu1 }
 0x1f3   :  { %v456_v17 = vadd.bf16 %v448_v8, %v416_v11  ;;  %v414_v18 = vpop.f32.mrb[3].mxu1 }
 0x1f4   :  { %v457_v19 = vadd.bf16 %v455_v10, %v417_v13 }
 0x1f5   :  { %v458_v20 = vmax.bf16 %v671_v1, %v456_v17 }
 0x1f6   :  { %v459_v22 = vmax.bf16 %v671_v1, %v457_v19 }
 0x1f7   :  { %v460_v24 = vunpack.c.l.bf16 %v458_v20 }
 0x1f8   :  { %v461_v25 = vunpack.c.l.bf16 %v459_v22 }
 0x1f9   :  { %v474_v26 = vmul.f32 %v467_v21, %v460_v24 }
 0x1fa   :  { %v475_v27 = vmul.f32 %v471_v23, %v461_v25 }
 0x1fc   :  { %v476_v28 = vadd.f32 %v475_v27, %v474_v26 }
 0x1fe   :  { %477 = vadd.xlane.f32.xlu0 %v476_v28 }
 0x28b   :  { %v478_v30 = vpop.xlane.xlu0 %477 }
 0x28c   :  { %v486_v31 = vadd.f32 %v534_v29, %v478_v30 }
 0x28e   :  { %488 = vst.msk [vmem:[%s782_s7] sm:$0xff] %vm487_vm1, %v486_v31 }
 0x28f   :  { %493 = vsyncpa [#allocation4], 1 }
 0x290   :  { %494 = vsyncpa [#allocation6], 1 }

</bundles_post_ra>
